<compile_context>
chip_gen: v7x
topology: tpu7x:2x2x1
jax: 0.10.0
libtpu: 0.0.40
codegen_flags: <defaults>
</compile_context>

<pallas_src>
import jax
import jax.numpy as jnp
from jax.experimental import pallas as pl
from jax.experimental.pallas import tpu as pltpu

LANE = 128


def _round_up(n, m):
    return ((n + m - 1) // m) * m


def _pad2(a, rows, cols, value=0.0):
    r, c = a.shape
    return jnp.pad(a, ((0, rows - r), (0, cols - c)), constant_values=value)


def _fold_bn(w1, b1, gamma, beta, mean, var, eps=1e-5):
    scale = gamma / jnp.sqrt(var + eps)
    return w1 * scale[None, :], (b1 - mean) * scale + beta


# ----------------------------- fused Pallas kernel -----------------------------

def _make_gin_kernel(fp, hp, l1p, cp, w_offs):
    (o_w11, o_w21, o_w12, o_w22, o_w13, o_w23,
     o_h1a, o_h1b, o_h1c, o_h2) = w_offs

    def kernel(a_ref, x_ref, w_ref, b_ref, p_ref, o_ref):
        a = a_ref[...]            # bf16 [Np, Np]: DMA'd into VMEM once, reused 3x
        pool = p_ref[...]         # bf16 [Gp, Np]
        bias = b_ref[...]         # f32  [8, Lmax] bias slab (tiny; load whole)

        def w(off, rows, cols):   # static slice of the packed bf16 weight slab
            return w_ref[off:off + rows, :cols]

        def b(i, cols):
            return bias[i:i + 1, :cols]

        def gin_conv(h, w1, b1, w2, b2):
            # (1 + eps) * h + A @ h with eps = 0; bf16 MXU operands, f32 accumulate.
            agg = (jnp.dot(a, h, preferred_element_type=jnp.float32)
                   + h.astype(jnp.float32))
            # Linear (eval BatchNorm folded in) -> ReLU     [f32 elementwise]
            z = jnp.dot(agg.astype(jnp.bfloat16), w1,
                        preferred_element_type=jnp.float32) + b1
            z = jnp.maximum(z, 0.0)
            # Linear -> ReLU
            z = jnp.dot(z.astype(jnp.bfloat16), w2,
                        preferred_element_type=jnp.float32) + b2
            z = jnp.maximum(z, 0.0)
            return z.astype(jnp.bfloat16)   # one cast feeds A@h, P@h and next w1

        # conv -> pool immediately: only the current h stays resident.
        h = gin_conv(x_ref[...],
                     w(o_w11, fp, hp), b(0, hp), w(o_w21, hp, hp), b(1, hp))
        p1 = jnp.dot(pool, h, preferred_element_type=jnp.float32)
        h = gin_conv(h, w(o_w12, hp, hp), b(2, hp), w(o_w22, hp, hp), b(3, hp))
        p2 = jnp.dot(pool, h, preferred_element_type=jnp.float32)
        h = gin_conv(h, w(o_w13, hp, hp), b(4, hp), w(o_w23, hp, hp), b(5, hp))
        p3 = jnp.dot(pool, h, preferred_element_type=jnp.float32)

        # cat(p1,p2,p3) @ W_lin1 == p1 @ W1a + p2 @ W1b + p3 @ W1c   (no lane concat)
        z = (jnp.dot(p1.astype(jnp.bfloat16), w(o_h1a, hp, l1p),
                     preferred_element_type=jnp.float32)
             + jnp.dot(p2.astype(jnp.bfloat16), w(o_h1b, hp, l1p),
                       preferred_element_type=jnp.float32)
             + jnp.dot(p3.astype(jnp.bfloat16), w(o_h1c, hp, l1p),
                       preferred_element_type=jnp.float32)
             + b(6, l1p))
        z = jnp.maximum(z, 0.0)
        # dropout(p=0.5) is identity in eval mode
        logits = jnp.dot(z.astype(jnp.bfloat16), w(o_h2, l1p, cp),
                         preferred_element_type=jnp.float32) + b(7, cp)

        # log_softmax along the lane (class) axis; padded classes carry a -1e30 bias
        # so they contribute exp(.) == 0 and the result on real classes is exact.
        m = jnp.max(logits, axis=-1, keepdims=True)
        lse = jnp.log(jnp.sum(jnp.exp(logits - m), axis=-1, keepdims=True)) + m
        o_ref[...] = logits - lse

    return kernel


# ----------------------------- parameter preparation -----------------------------

def prepare_kernel_params(conv_params, head_params, f_in, dim_h, num_classes):
    """BN-fold, lane-pad to 128 and pack all weights / biases into two slabs."""
    fp = _round_up(f_in, LANE)
    hp = _round_up(dim_h, LANE)
    l1p = _round_up(3 * dim_h, LANE)
    cp = _round_up(num_classes, LANE)
    lmax = max(hp, l1p, cp)

    ws, bs = [], []
    in_pads = (fp, hp, hp)
    for (w1, b1, gamma, beta, mean, var, w2, b2), dinp in zip(conv_params, in_pads):
        w1f, b1f = _fold_bn(w1, b1, gamma, beta, mean, var)
        ws += [_pad2(w1f, dinp, lmax), _pad2(w2, hp, lmax)]
        bs += [_pad2(b1f[None, :], 1, lmax), _pad2(b2[None, :], 1, lmax)]

    w_lin1, b_lin1, w_lin2, b_lin2 = head_params
    ws += [_pad2(w_lin1[:dim_h], hp, lmax),
           _pad2(w_lin1[dim_h:2 * dim_h], hp, lmax),
           _pad2(w_lin1[2 * dim_h:], hp, lmax),
           _pad2(w_lin2, l1p, lmax)]
    bs += [_pad2(b_lin1[None, :], 1, lmax)]
    # padded classes get ~-inf logits -> exact log_softmax on real classes
    bh2 = jnp.pad(b_lin2[None, :], ((0, 0), (0, cp - num_classes)),
                  constant_values=-1e30)
    bs += [_pad2(bh2, 1, lmax)]

    # static row offsets of each weight inside the slab
    # order: w11 w21 | w12 w22 | w13 w23 | wh1a wh1b wh1c | wh2
    rows = [fp, hp, hp, hp, hp, hp, hp, hp, hp, l1p]
    offs, off = [], 0
    for r in rows:
        offs.append(off)
        off += r

    w_slab = jnp.concatenate(ws, axis=0).astype(jnp.bfloat16)   # [fp+8*hp+l1p, lmax]
    b_slab = jnp.concatenate(bs, axis=0).astype(jnp.float32)    # [8, lmax]
    return w_slab, b_slab, (fp, hp, l1p, cp, lmax, tuple(offs))


# ----------------------------- forward wrapper -----------------------------

def gin_forward(x, edge_index, batch, conv_params, head_params, num_graphs):
    N, f_in = x.shape
    dim_h = conv_params[0][6].shape[0]          # conv1's second Linear is [H, H]
    num_classes = head_params[2].shape[1]

    w_slab, b_slab, (fp, hp, l1p, cp, lmax, offs) = prepare_kernel_params(
        conv_params, head_params, f_in, dim_h, num_classes)

    np_ = _round_up(N, 8)                       # sublane-pad nodes
    gp = _round_up(num_graphs, 8)               # sublane-pad graphs -> unmasked output vst

    # Dense adjacency built directly in bf16 (no f32 N^2 HBM round-trip):
    # A[i, j] = #edges j -> i (messages flow source -> target); edge multiplicities
    # <= 256 are exact in bf16.
    a = (jnp.zeros((np_, np_), jnp.bfloat16)
         .at[edge_index[1], edge_index[0]]
         .add(jnp.ones((edge_index.shape[1],), jnp.bfloat16)))

    # pooling matrix: P[g, n] = 1 iff batch[n] == g (global_add_pool == P @ h).
    # Padded nodes are assigned an out-of-range graph id so they pool nowhere.
    batch_p = jnp.pad(batch, (0, np_ - N), constant_values=num_graphs)
    pool = (batch_p[None, :] == jnp.arange(gp)[:, None]).astype(jnp.bfloat16)

    x_p = _pad2(x, np_, fp).astype(jnp.bfloat16)

    # --- VMEM budget & cost model for the grid-less fused call ---------------
    in_bytes = (2 * np_ * np_ + 2 * np_ * fp + 2 * w_slab.shape[0] * lmax
                + 4 * 8 * lmax + 2 * gp * np_)
    out_bytes = 4 * gp * cp
    act_bytes = 8 * np_ * max(lmax, fp) * 4            # activation headroom
    vmem_limit = int(min(max(2 * (in_bytes + out_bytes + act_bytes), 32 << 20),
                         64 << 20))                    # stay within v7x's 64 MiB VMEM
    flops = int(
        2 * np_ * np_ * (fp + 2 * hp)                  # 3x A @ h aggregation
        + 2 * np_ * (fp * hp + hp * hp)                # conv1 MLP
        + 2 * (2 * np_ * hp * hp + 2 * np_ * hp * hp)  # conv2/3 MLPs
        + 3 * 2 * gp * np_ * hp                        # pooling
        + 3 * 2 * gp * hp * l1p + 2 * gp * l1p * cp)   # head
    cost = pl.CostEstimate(flops=flops, transcendentals=gp * (cp + 1),
                           bytes_accessed=int(in_bytes + out_bytes))

    kernel = _make_gin_kernel(fp, hp, l1p, cp, offs)
    args = (a, x_p, w_slab, b_slab, pool)
    out_p = pl.pallas_call(
        kernel,
        out_shape=jax.ShapeDtypeStruct((gp, cp), jnp.float32),
        in_specs=[pl.BlockSpec(memory_space=pltpu.MemorySpace.VMEM)] * len(args),
        out_specs=pl.BlockSpec(memory_space=pltpu.MemorySpace.VMEM),
        compiler_params=pltpu.CompilerParams(vmem_limit_bytes=vmem_limit),
        cost_estimate=cost,
    )(*args)
    return out_p[:num_graphs, :num_classes]


# ----------------------------- pure-JAX reference -----------------------------
# Mirrors the kernel's numerics (bf16 MXU operands, f32 accumulation/elementwise).

def gin_reference(x, edge_index, batch, conv_params, head_params, num_graphs):
    N = x.shape[0]
    a = (jnp.zeros((N, N), jnp.float32)
         .at[edge_index[1], edge_index[0]].add(1.0)).astype(jnp.bfloat16)

    def conv(h, params):
        w1, b1, gamma, beta, mean, var, w2, b2 = params
        w1f, b1f = _fold_bn(w1, b1, gamma, beta, mean, var)
        agg = jnp.dot(a, h, preferred_element_type=jnp.float32) + h.astype(jnp.float32)
        z = jnp.dot(agg.astype(jnp.bfloat16), w1f.astype(jnp.bfloat16),
                    preferred_element_type=jnp.float32) + b1f
        z = jnp.maximum(z, 0.0)
        z = jnp.dot(z.astype(jnp.bfloat16), w2.astype(jnp.bfloat16),
                    preferred_element_type=jnp.float32) + b2
        return jnp.maximum(z, 0.0).astype(jnp.bfloat16)

    h1 = conv(x.astype(jnp.bfloat16), conv_params[0])
    h2 = conv(h1, conv_params[1])
    h3 = conv(h2, conv_params[2])

    pool = (batch[None, :] == jnp.arange(num_graphs)[:, None]).astype(jnp.bfloat16)
    p = jnp.concatenate(
        [jnp.dot(pool, h, preferred_element_type=jnp.float32) for h in (h1, h2, h3)],
        axis=1)
    w_lin1, b_lin1, w_lin2, b_lin2 = head_params
    z = jnp.maximum(jnp.dot(p.astype(jnp.bfloat16), w_lin1.astype(jnp.bfloat16),
                            preferred_element_type=jnp.float32) + b_lin1, 0.0)
    logits = jnp.dot(z.astype(jnp.bfloat16), w_lin2.astype(jnp.bfloat16),
                     preferred_element_type=jnp.float32) + b_lin2
    return jax.nn.log_softmax(logits, axis=1)


# ----------------------------- deterministic params -----------------------------

def make_params(key, node_feature, dim_h, num_classes):
    keys = iter(jax.random.split(key, 32))

    def lin(fan_in, fan_out):
        bound = float(1.0 / (fan_in ** 0.5))
        w = jax.random.uniform(next(keys), (fan_in, fan_out), jnp.float32, -bound, bound)
        b = jax.random.uniform(next(keys), (fan_out,), jnp.float32, -bound, bound)
        return w, b

    def conv(f_in):
        w1, b1 = lin(f_in, dim_h)
        w2, b2 = lin(dim_h, dim_h)
        # BatchNorm1d eval defaults: gamma=1, beta=0, running_mean=0, running_var=1
        gamma = jnp.ones((dim_h,), jnp.float32)
        beta = jnp.zeros((dim_h,), jnp.float32)
        mean = jnp.zeros((dim_h,), jnp.float32)
        var = jnp.ones((dim_h,), jnp.float32)
        return (w1, b1, gamma, beta, mean, var, w2, b2)

    convs = (conv(node_feature), conv(dim_h), conv(dim_h))
    w_lin1, b_lin1 = lin(3 * dim_h, 3 * dim_h)
    w_lin2, b_lin2 = lin(3 * dim_h, num_classes)
    return convs, (w_lin1, b_lin1, w_lin2, b_lin2)


# ----------------------------- main -----------------------------

if __name__ == "__main__":
    key = jax.random.PRNGKey(0)
    N, F_IN, DIM_H, NUM_CLASSES, NUM_GRAPHS = 16, 8, 32, 4, 2

    k_x, k_p = jax.random.split(key)
    x = jax.random.normal(k_x, (N, F_IN), jnp.float32)

    # two graphs of 8 nodes each, bidirectional ring topology
    src, dst = [], []
    nodes_per_graph = N // NUM_GRAPHS
    for g in range(NUM_GRAPHS):
        base = g * nodes_per_graph
        for i in range(nodes_per_graph):
            s = base + i
            d = base + (i + 1) % nodes_per_graph
            src += [s, d]
            dst += [d, s]
    edge_index = jnp.array([src, dst], dtype=jnp.int32)                              # [2, E]
    batch = jnp.repeat(jnp.arange(NUM_GRAPHS, dtype=jnp.int32), nodes_per_graph)     # [N]

    conv_params, head_params = make_params(k_p, F_IN, DIM_H, NUM_CLASSES)

    out = gin_forward(x, edge_index, batch, conv_params, head_params, NUM_GRAPHS)
    out = jax.block_until_ready(out)

    ref = gin_reference(x, edge_index, batch, conv_params, head_params, NUM_GRAPHS)
    ref = jax.block_until_ready(ref)

    assert out.shape == (NUM_GRAPHS, NUM_CLASSES)
    # rows of log_softmax must exp-sum to 1
    assert jnp.allclose(jnp.sum(jnp.exp(out), axis=1), 1.0, atol=1e-5)
    # fused Pallas kernel must match the (same-precision) pure-JAX reference
    assert jnp.allclose(out, ref, atol=2e-2, rtol=2e-2)
    print("KERNEL_OK")
</pallas_src>

<mosaic_0001>
module attributes {stable_mosaic.version = 11 : i64} {
  func.func @kernel(%arg0: memref<16x16xbf16, #tpu.memory_space<vmem>>, %arg1: memref<16x128xbf16, #tpu.memory_space<vmem>>, %arg2: memref<1280x128xbf16, #tpu.memory_space<vmem>>, %arg3: memref<8x128xf32, #tpu.memory_space<vmem>>, %arg4: memref<8x16xbf16, #tpu.memory_space<vmem>>, %arg5: memref<8x128xf32, #tpu.memory_space<vmem>>) attributes {dimension_semantics = [], scalar_prefetch = 0 : i64, scratch_operands = 0 : i64, tpu.core_type = #tpu.core_type<tc>} {
    %c0 = arith.constant 0 : index
    %c0_0 = arith.constant 0 : index
    %0 = vector.load %arg0[%c0, %c0_0] : memref<16x16xbf16, #tpu.memory_space<vmem>>, vector<16x16xbf16>
    %c0_1 = arith.constant 0 : index
    %c0_2 = arith.constant 0 : index
    %1 = vector.load %arg4[%c0_1, %c0_2] : memref<8x16xbf16, #tpu.memory_space<vmem>>, vector<8x16xbf16>
    %c0_3 = arith.constant 0 : index
    %c0_4 = arith.constant 0 : index
    %2 = vector.load %arg3[%c0_3, %c0_4] : memref<8x128xf32, #tpu.memory_space<vmem>>, vector<8x128xf32>
    %c0_5 = arith.constant 0 : index
    %c0_6 = arith.constant 0 : index
    %3 = vector.load %arg1[%c0_5, %c0_6] : memref<16x128xbf16, #tpu.memory_space<vmem>>, vector<16x128xbf16>
    %c0_7 = arith.constant 0 : index
    %c0_8 = arith.constant 0 : index
    %4 = vector.load %arg2[%c0_7, %c0_8] : memref<1280x128xbf16, #tpu.memory_space<vmem>>, vector<128x128xbf16>
    %5 = vector.extract_strided_slice %2 {offsets = [0, 0], sizes = [1, 128], strides = [1, 1]} : vector<8x128xf32> to vector<1x128xf32>
    %c128 = arith.constant 128 : index
    %c0_9 = arith.constant 0 : index
    %6 = vector.load %arg2[%c128, %c0_9] : memref<1280x128xbf16, #tpu.memory_space<vmem>>, vector<128x128xbf16>
    %7 = vector.extract_strided_slice %2 {offsets = [1, 0], sizes = [1, 128], strides = [1, 1]} : vector<8x128xf32> to vector<1x128xf32>
    %cst = arith.constant dense<0.000000e+00> : vector<16x128xf32>
    %8 = tpu.matmul %0, %3, %cst {dimension_numbers = #tpu.dot_dimension_numbers<[1], [0], [0], [1], [0, 0, 1, 1], [], []>} : vector<16x16xbf16>, vector<16x128xbf16>, vector<16x128xf32> -> vector<16x128xf32>
    %9 = arith.extf %3 : vector<16x128xbf16> to vector<16x128xf32>
    %10 = arith.addf %8, %9 : vector<16x128xf32>
    %11 = arith.truncf %10 : vector<16x128xf32> to vector<16x128xbf16>
    %cst_10 = arith.constant dense<0.000000e+00> : vector<16x128xf32>
    %12 = tpu.matmul %11, %4, %cst_10 {dimension_numbers = #tpu.dot_dimension_numbers<[1], [0], [0], [1], [0, 0, 1, 1], [], []>} : vector<16x128xbf16>, vector<128x128xbf16>, vector<16x128xf32> -> vector<16x128xf32>
    %13 = vector.broadcast %5 : vector<1x128xf32> to vector<16x128xf32>
    %14 = arith.addf %12, %13 : vector<16x128xf32>
    %cst_11 = arith.constant 0.000000e+00 : f32
    %15 = vector.broadcast %cst_11 : f32 to vector<16x128xf32>
    %16 = arith.maximumf %14, %15 : vector<16x128xf32>
    %17 = arith.truncf %16 : vector<16x128xf32> to vector<16x128xbf16>
    %cst_12 = arith.constant dense<0.000000e+00> : vector<16x128xf32>
    %18 = tpu.matmul %17, %6, %cst_12 {dimension_numbers = #tpu.dot_dimension_numbers<[1], [0], [0], [1], [0, 0, 1, 1], [], []>} : vector<16x128xbf16>, vector<128x128xbf16>, vector<16x128xf32> -> vector<16x128xf32>
    %19 = vector.broadcast %7 : vector<1x128xf32> to vector<16x128xf32>
    %20 = arith.addf %18, %19 : vector<16x128xf32>
    %cst_13 = arith.constant 0.000000e+00 : f32
    %21 = vector.broadcast %cst_13 : f32 to vector<16x128xf32>
    %22 = arith.maximumf %20, %21 : vector<16x128xf32>
    %23 = arith.truncf %22 : vector<16x128xf32> to vector<16x128xbf16>
    %cst_14 = arith.constant dense<0.000000e+00> : vector<8x128xf32>
    %24 = tpu.matmul %1, %23, %cst_14 {dimension_numbers = #tpu.dot_dimension_numbers<[1], [0], [0], [1], [0, 0, 1, 1], [], []>} : vector<8x16xbf16>, vector<16x128xbf16>, vector<8x128xf32> -> vector<8x128xf32>
    %c256 = arith.constant 256 : index
    %c0_15 = arith.constant 0 : index
    %25 = vector.load %arg2[%c256, %c0_15] : memref<1280x128xbf16, #tpu.memory_space<vmem>>, vector<128x128xbf16>
    %26 = vector.extract_strided_slice %2 {offsets = [2, 0], sizes = [1, 128], strides = [1, 1]} : vector<8x128xf32> to vector<1x128xf32>
    %c384 = arith.constant 384 : index
    %c0_16 = arith.constant 0 : index
    %27 = vector.load %arg2[%c384, %c0_16] : memref<1280x128xbf16, #tpu.memory_space<vmem>>, vector<128x128xbf16>
    %28 = vector.extract_strided_slice %2 {offsets = [3, 0], sizes = [1, 128], strides = [1, 1]} : vector<8x128xf32> to vector<1x128xf32>
    %cst_17 = arith.constant dense<0.000000e+00> : vector<16x128xf32>
    %29 = tpu.matmul %0, %23, %cst_17 {dimension_numbers = #tpu.dot_dimension_numbers<[1], [0], [0], [1], [0, 0, 1, 1], [], []>} : vector<16x16xbf16>, vector<16x128xbf16>, vector<16x128xf32> -> vector<16x128xf32>
    %30 = arith.extf %23 : vector<16x128xbf16> to vector<16x128xf32>
    %31 = arith.addf %29, %30 : vector<16x128xf32>
    %32 = arith.truncf %31 : vector<16x128xf32> to vector<16x128xbf16>
    %cst_18 = arith.constant dense<0.000000e+00> : vector<16x128xf32>
    %33 = tpu.matmul %32, %25, %cst_18 {dimension_numbers = #tpu.dot_dimension_numbers<[1], [0], [0], [1], [0, 0, 1, 1], [], []>} : vector<16x128xbf16>, vector<128x128xbf16>, vector<16x128xf32> -> vector<16x128xf32>
    %34 = vector.broadcast %26 : vector<1x128xf32> to vector<16x128xf32>
    %35 = arith.addf %33, %34 : vector<16x128xf32>
    %cst_19 = arith.constant 0.000000e+00 : f32
    %36 = vector.broadcast %cst_19 : f32 to vector<16x128xf32>
    %37 = arith.maximumf %35, %36 : vector<16x128xf32>
    %38 = arith.truncf %37 : vector<16x128xf32> to vector<16x128xbf16>
    %cst_20 = arith.constant dense<0.000000e+00> : vector<16x128xf32>
    %39 = tpu.matmul %38, %27, %cst_20 {dimension_numbers = #tpu.dot_dimension_numbers<[1], [0], [0], [1], [0, 0, 1, 1], [], []>} : vector<16x128xbf16>, vector<128x128xbf16>, vector<16x128xf32> -> vector<16x128xf32>
    %40 = vector.broadcast %28 : vector<1x128xf32> to vector<16x128xf32>
    %41 = arith.addf %39, %40 : vector<16x128xf32>
    %cst_21 = arith.constant 0.000000e+00 : f32
    %42 = vector.broadcast %cst_21 : f32 to vector<16x128xf32>
    %43 = arith.maximumf %41, %42 : vector<16x128xf32>
    %44 = arith.truncf %43 : vector<16x128xf32> to vector<16x128xbf16>
    %cst_22 = arith.constant dense<0.000000e+00> : vector<8x128xf32>
    %45 = tpu.matmul %1, %44, %cst_22 {dimension_numbers = #tpu.dot_dimension_numbers<[1], [0], [0], [1], [0, 0, 1, 1], [], []>} : vector<8x16xbf16>, vector<16x128xbf16>, vector<8x128xf32> -> vector<8x128xf32>
    %c512 = arith.constant 512 : index
    %c0_23 = arith.constant 0 : index
    %46 = vector.load %arg2[%c512, %c0_23] : memref<1280x128xbf16, #tpu.memory_space<vmem>>, vector<128x128xbf16>
    %47 = vector.extract_strided_slice %2 {offsets = [4, 0], sizes = [1, 128], strides = [1, 1]} : vector<8x128xf32> to vector<1x128xf32>
    %c640 = arith.constant 640 : index
    %c0_24 = arith.constant 0 : index
    %48 = vector.load %arg2[%c640, %c0_24] : memref<1280x128xbf16, #tpu.memory_space<vmem>>, vector<128x128xbf16>
    %49 = vector.extract_strided_slice %2 {offsets = [5, 0], sizes = [1, 128], strides = [1, 1]} : vector<8x128xf32> to vector<1x128xf32>
    %cst_25 = arith.constant dense<0.000000e+00> : vector<16x128xf32>
    %50 = tpu.matmul %0, %44, %cst_25 {dimension_numbers = #tpu.dot_dimension_numbers<[1], [0], [0], [1], [0, 0, 1, 1], [], []>} : vector<16x16xbf16>, vector<16x128xbf16>, vector<16x128xf32> -> vector<16x128xf32>
    %51 = arith.extf %44 : vector<16x128xbf16> to vector<16x128xf32>
    %52 = arith.addf %50, %51 : vector<16x128xf32>
    %53 = arith.truncf %52 : vector<16x128xf32> to vector<16x128xbf16>
    %cst_26 = arith.constant dense<0.000000e+00> : vector<16x128xf32>
    %54 = tpu.matmul %53, %46, %cst_26 {dimension_numbers = #tpu.dot_dimension_numbers<[1], [0], [0], [1], [0, 0, 1, 1], [], []>} : vector<16x128xbf16>, vector<128x128xbf16>, vector<16x128xf32> -> vector<16x128xf32>
    %55 = vector.broadcast %47 : vector<1x128xf32> to vector<16x128xf32>
    %56 = arith.addf %54, %55 : vector<16x128xf32>
    %cst_27 = arith.constant 0.000000e+00 : f32
    %57 = vector.broadcast %cst_27 : f32 to vector<16x128xf32>
    %58 = arith.maximumf %56, %57 : vector<16x128xf32>
    %59 = arith.truncf %58 : vector<16x128xf32> to vector<16x128xbf16>
    %cst_28 = arith.constant dense<0.000000e+00> : vector<16x128xf32>
    %60 = tpu.matmul %59, %48, %cst_28 {dimension_numbers = #tpu.dot_dimension_numbers<[1], [0], [0], [1], [0, 0, 1, 1], [], []>} : vector<16x128xbf16>, vector<128x128xbf16>, vector<16x128xf32> -> vector<16x128xf32>
    %61 = vector.broadcast %49 : vector<1x128xf32> to vector<16x128xf32>
    %62 = arith.addf %60, %61 : vector<16x128xf32>
    %cst_29 = arith.constant 0.000000e+00 : f32
    %63 = vector.broadcast %cst_29 : f32 to vector<16x128xf32>
    %64 = arith.maximumf %62, %63 : vector<16x128xf32>
    %65 = arith.truncf %64 : vector<16x128xf32> to vector<16x128xbf16>
    %cst_30 = arith.constant dense<0.000000e+00> : vector<8x128xf32>
    %66 = tpu.matmul %1, %65, %cst_30 {dimension_numbers = #tpu.dot_dimension_numbers<[1], [0], [0], [1], [0, 0, 1, 1], [], []>} : vector<8x16xbf16>, vector<16x128xbf16>, vector<8x128xf32> -> vector<8x128xf32>
    %67 = arith.truncf %24 : vector<8x128xf32> to vector<8x128xbf16>
    %c768 = arith.constant 768 : index
    %c0_31 = arith.constant 0 : index
    %68 = vector.load %arg2[%c768, %c0_31] : memref<1280x128xbf16, #tpu.memory_space<vmem>>, vector<128x128xbf16>
    %cst_32 = arith.constant dense<0.000000e+00> : vector<8x128xf32>
    %69 = tpu.matmul %67, %68, %cst_32 {dimension_numbers = #tpu.dot_dimension_numbers<[1], [0], [0], [1], [0, 0, 1, 1], [], []>} : vector<8x128xbf16>, vector<128x128xbf16>, vector<8x128xf32> -> vector<8x128xf32>
    %70 = arith.truncf %45 : vector<8x128xf32> to vector<8x128xbf16>
    %c896 = arith.constant 896 : index
    %c0_33 = arith.constant 0 : index
    %71 = vector.load %arg2[%c896, %c0_33] : memref<1280x128xbf16, #tpu.memory_space<vmem>>, vector<128x128xbf16>
    %cst_34 = arith.constant dense<0.000000e+00> : vector<8x128xf32>
    %72 = tpu.matmul %70, %71, %cst_34 {dimension_numbers = #tpu.dot_dimension_numbers<[1], [0], [0], [1], [0, 0, 1, 1], [], []>} : vector<8x128xbf16>, vector<128x128xbf16>, vector<8x128xf32> -> vector<8x128xf32>
    %73 = arith.addf %69, %72 : vector<8x128xf32>
    %74 = arith.truncf %66 : vector<8x128xf32> to vector<8x128xbf16>
    %c1024 = arith.constant 1024 : index
    %c0_35 = arith.constant 0 : index
    %75 = vector.load %arg2[%c1024, %c0_35] : memref<1280x128xbf16, #tpu.memory_space<vmem>>, vector<128x128xbf16>
    %cst_36 = arith.constant dense<0.000000e+00> : vector<8x128xf32>
    %76 = tpu.matmul %74, %75, %cst_36 {dimension_numbers = #tpu.dot_dimension_numbers<[1], [0], [0], [1], [0, 0, 1, 1], [], []>} : vector<8x128xbf16>, vector<128x128xbf16>, vector<8x128xf32> -> vector<8x128xf32>
    %77 = arith.addf %73, %76 : vector<8x128xf32>
    %78 = vector.extract_strided_slice %2 {offsets = [6, 0], sizes = [1, 128], strides = [1, 1]} : vector<8x128xf32> to vector<1x128xf32>
    %79 = vector.broadcast %78 : vector<1x128xf32> to vector<8x128xf32>
    %80 = arith.addf %77, %79 : vector<8x128xf32>
    %cst_37 = arith.constant 0.000000e+00 : f32
    %81 = vector.broadcast %cst_37 : f32 to vector<8x128xf32>
    %82 = arith.maximumf %80, %81 : vector<8x128xf32>
    %83 = arith.truncf %82 : vector<8x128xf32> to vector<8x128xbf16>
    %c1152 = arith.constant 1152 : index
    %c0_38 = arith.constant 0 : index
    %84 = vector.load %arg2[%c1152, %c0_38] : memref<1280x128xbf16, #tpu.memory_space<vmem>>, vector<128x128xbf16>
    %cst_39 = arith.constant dense<0.000000e+00> : vector<8x128xf32>
    %85 = tpu.matmul %83, %84, %cst_39 {dimension_numbers = #tpu.dot_dimension_numbers<[1], [0], [0], [1], [0, 0, 1, 1], [], []>} : vector<8x128xbf16>, vector<128x128xbf16>, vector<8x128xf32> -> vector<8x128xf32>
    %86 = vector.extract_strided_slice %2 {offsets = [7, 0], sizes = [1, 128], strides = [1, 1]} : vector<8x128xf32> to vector<1x128xf32>
    %87 = vector.broadcast %86 : vector<1x128xf32> to vector<8x128xf32>
    %88 = arith.addf %85, %87 : vector<8x128xf32>
    %cst_40 = arith.constant dense<0xFF800000> : vector<8xf32>
    %89 = vector.multi_reduction <maximumf>, %88, %cst_40 [1] : vector<8x128xf32> to vector<8xf32>
    %90 = vector.shape_cast %89 : vector<8xf32> to vector<8x1xf32>
    %91 = vector.broadcast %90 : vector<8x1xf32> to vector<8x128xf32>
    %92 = arith.subf %88, %91 : vector<8x128xf32>
    %93 = math.exp %92 : vector<8x128xf32>
    %cst_41 = arith.constant dense<0.000000e+00> : vector<8xf32>
    %94 = vector.multi_reduction <add>, %93, %cst_41 [1] : vector<8x128xf32> to vector<8xf32>
    %95 = vector.shape_cast %94 : vector<8xf32> to vector<8x1xf32>
    %96 = math.log %95 : vector<8x1xf32>
    %97 = arith.addf %96, %90 : vector<8x1xf32>
    %98 = vector.broadcast %97 : vector<8x1xf32> to vector<8x128xf32>
    %99 = arith.subf %88, %98 : vector<8x128xf32>
    %c0_42 = arith.constant 0 : index
    %c0_43 = arith.constant 0 : index
    %100 = vector.load %arg5[%c0_42, %c0_43] : memref<8x128xf32, #tpu.memory_space<vmem>>, vector<8x128xf32>
    tpu.vector_store %arg5[%c0_42, %c0_43], %99 {strides = array<i32>} : memref<8x128xf32, #tpu.memory_space<vmem>>, vector<8x128xf32>,
    return
  }
}

</mosaic_0001>

<bundles_post_ra>
// kernel: tpu_custom_call.1
= control target key start
LH: loop header
LB: loop body
LE: loop exit
PB: predicated region body
PF: predicated region fallthrough
CT: control target
= control target key end

     0   :  { %10 = vsyncpa [#allocation3], 0  ;;  %s2351_s0 = inlined_call_operand.hbm [shape: bf16[16,16], index: 0, kind: input, shape index: {}]   ;;  %s2352_s1 = inlined_call_operand.hbm [shape: bf16[16,128], index: 1, kind: input, shape index: {}]   ;;  %s2353_s2 = inlined_call_operand.hbm [shape: bf16[1280,128], index: 2, kind: input, shape index: {}]   ;;  %s2354_s3 = inlined_call_operand.vmem [shape: f32[8,128], index: 3, kind: input, shape index: {}]   ;;  %s2355_s4 = inlined_call_operand.vmem [shape: bf16[8,16], index: 4, kind: input, shape index: {}]   ;;  %s2356_s5 = inlined_call_operand.hbm [shape: f32[8,128], index: 5, kind: output, shape index: {}]  }
   0x1   :  { %11 = vsyncpa [#allocation6], 0 }
   0x2   :  { %12 = vsyncpa [#allocation4], 0  ;;  %s2085_s18 = smov [#allocation5]   ;;  %s2086_s20 = smov [#allocation2]  }
   0x3   :  { %s30_s19 = sshll.u32 %s2085_s18, 4  ;;  %s18_s21 = sshll.u32 %s2086_s20, 4  ;;  %s31_s19 = int_to_ptr.vmem [resolvable:$true] %s30_s19  ;;  %s2123_s21 = int_to_ptr.vmem [resolvable:$true] %s18_s21 }
   0x4   :  { %s1991_s24 = scalar_lea.hbm %s2352_s1, 128 }
   0x5   :  { %p1992_p0 = scmp.ne.s32.totalorder %s2352_s1, %s1991_s24  ;;  %p1995_p1 = scmp.lt.u32.totalorder %s1991_s24, %s2352_s1 }
   0x7   :  { %p1997_p2 = pnand %p1995_p1, %p1992_p0 }
   0x9   :  { %2000 = shalt.err (!%p1997_p2)
}
   0xa   :  { %s2001_s29 = scalar_lea.vmem %s31_s19, 128  ;;  %p2006_p4 = scmp.lt.s32.totalorder %s31_s19, %s31_s19 }
   0xb   :  { %p2002_p3 = scmp.ne.s32.totalorder %s31_s19, %s2001_s29  ;;  %p2007_p5 = scmp.lt.s32.totalorder %s2001_s29, %s2001_s29 }
   0xd   :  { %p2008_p6 = por %p2007_p5, %p2006_p4 }
   0xf   :  { %p2009_p7 = pnand %p2008_p6, %p2002_p3 }
  0x11   :  { %2012 = shalt.err (!%p2009_p7)
}
  0x12   :  { %s2087_s30 = smov 64   ;;  %s2088_s6 = smov 4  }
  0x13   :  { %36 = dma.hbm_to_vmem [thread:$0]  %s2352_s1, 128, %s31_s19, [#allocation6], %s2087_s30, %s2087_s30, %s2088_s6  }
  0x14   :  { %s2013_s11 = scalar_lea.hbm %s2351_s0, 128 }
  0x15   :  { %p2014_p8 = scmp.ne.s32.totalorder %s2351_s0, %s2013_s11  ;;  %p2017_p9 = scmp.lt.u32.totalorder %s2013_s11, %s2351_s0 }
  0x17   :  { %p2019_p10 = pnand %p2017_p9, %p2014_p8 }
  0x19   :  { %2022 = shalt.err (!%p2019_p10)
}
  0x1a   :  { %s2023_s16 = scalar_lea.vmem %s2123_s21, 128  ;;  %p2028_p12 = scmp.lt.s32.totalorder %s2123_s21, %s2123_s21 }
  0x1b   :  { %p2024_p11 = scmp.ne.s32.totalorder %s2123_s21, %s2023_s16  ;;  %p2029_p13 = scmp.lt.s32.totalorder %s2023_s16, %s2023_s16 }
  0x1d   :  { %p2030_p0 = por %p2029_p13, %p2028_p12 }
  0x1f   :  { %p2031_p1 = pnand %p2030_p0, %p2024_p11 }
  0x21   :  { %2034 = shalt.err (!%p2031_p1)
}
  0x22   :  { %24 = dma.hbm_to_vmem [thread:$0]  %s2351_s0, 128, %s2123_s21, [#allocation3], %s2087_s30, %s2087_s30, %s2088_s6  }
  0x23   :  { %s2089_s18 = smov [#allocation7]   ;;  %s2035_s23 = scalar_lea.hbm %s2353_s2, 10240 }
  0x24   :  { %s42_s19 = sshll.u32 %s2089_s18, 4  ;;  %p2036_p2 = scmp.ne.s32.totalorder %s2353_s2, %s2035_s23  ;;  %s43_s19 = int_to_ptr.vmem [resolvable:$true] %s42_s19 }
  0x25   :  { %p2039_p3 = scmp.lt.u32.totalorder %s2035_s23, %s2353_s2 }
  0x27   :  { %p2041_p4 = pnand %p2039_p3, %p2036_p2 }
  0x29   :  { %2044 = shalt.err (!%p2041_p4)
}
  0x2a   :  { %s2045_s28 = scalar_lea.vmem %s43_s19, 10240  ;;  %p2050_p6 = scmp.lt.s32.totalorder %s43_s19, %s43_s19 }
  0x2b   :  { %p2046_p5 = scmp.ne.s32.totalorder %s43_s19, %s2045_s28  ;;  %p2051_p7 = scmp.lt.s32.totalorder %s2045_s28, %s2045_s28 }
  0x2d   :  { %p2052_p8 = por %p2051_p7, %p2050_p6 }
  0x2f   :  { %p2053_p9 = pnand %p2052_p8, %p2046_p5 }
  0x31   :  { %2056 = shalt.err (!%p2053_p9)
}
  0x32   :  { %48 = dma.hbm_to_vmem [thread:$0]  %s2353_s2, 10240, %s43_s19, [#allocation6], %s2087_s30, %s2087_s30, %s2088_s6  }
  0x33   :  { %2079 = dma.done.wait [#allocation3], 128  }
  0x34   :  { %2080 = vsyncadd [#allocation3], 4294967168 }
  0x35   :  { %2081 = dma.done.wait [#allocation6], 10368  }
  0x36   :  { %2082 = vsyncadd [#allocation6], 4294956928  ;;  %v2090_v0 = vmov 0.0   ;;  %vm2091_vm0 = vmmov 0   ;;  %v67_v1 = vld [vmem:[#allocation5] sm:$0xff]   ;;  %v2181_v2 = vld [vmem:[#allocation2] sm:$0xff]   ;;  %v160_v28 = vlaneseq }
  0x37   :  { %1660 = vmatprep.subr.bf16.mxu0 %v2090_v0  ;;  %1662 = vmatprep.mubr.msk.bf16.mxu0 %vm2091_vm0, %v2090_v0  ;;  %v1906_v3 = vld [vmem:[#allocation7] sm:$0xff]   ;;  %vm114_vm1 = vcmask 130048   ;;  %v1907_v4 = vld [vmem:[#allocation7 + $0x8] sm:$0xff]   ;;  %v1908_v5 = vld [vmem:[#allocation7 + $0x10] sm:$0xff]   ;;  %v101_v17 = vunpack.c.l.bf16 %v67_v1  ;;  %v102_v18 = vunpack.c.h.bf16 %v67_v1 }
  0x38   :  { %1666 = vmatprep.subr.bf16.mxu1 %v2090_v0  ;;  %1682 = vmatprep.mubr.msk.bf16.mxu1 %vm2091_vm0, %v2090_v0  ;;  %v1909_v6 = vld [vmem:[#allocation7 + $0x18] sm:$0xff]   ;;  %v1910_v7 = vld [vmem:[#allocation7 + $0x20] sm:$0xff]   ;;  %v1911_v8 = vld [vmem:[#allocation7 + $0x28] sm:$0xff]   ;;  %v2206_v29 = vshrl.u32 %v160_v28, 7 }
  0x39   :  { %1661 = vmatpush3.bf16.msra.mxu0 %v67_v1  ;;  %1667 = vmatpush3.bf16.msra.mxu1 %v1906_v3  ;;  %v1912_v9 = vld [vmem:[#allocation7 + $0x30] sm:$0xff]   ;;  %v1913_v10 = vld [vmem:[#allocation7 + $0x38] sm:$0xff]   ;;  %v1914_v11 = vld [vmem:[#allocation7 + $0x40] sm:$0xff]  }
  0x3a   :  { %1686 = vmatprep.subr.bf16.mxu0 %v2090_v0  ;;  %1668 = vmatprep.subr.bf16.mxu1 %v2090_v0  ;;  %v1915_v12 = vld [vmem:[#allocation7 + $0x48] sm:$0xff]   ;;  %v1916_v13 = vld [vmem:[#allocation7 + $0x50] sm:$0xff]   ;;  %v1917_v14 = vld [vmem:[#allocation7 + $0x58] sm:$0xff]   ;;  %v162_v30 = vsub.s32 0, %v2206_v29  ;;  %v258_v42 = vsub.s32 1, %v2206_v29 }
  0x3b   :  { %v1918_v15 = vld [vmem:[#allocation7 + $0x60] sm:$0xff]   ;;  %v1919_v16 = vld [vmem:[#allocation7 + $0x68] sm:$0xff]   ;;  %v1920_v26 = vld [vmem:[#allocation7 + $0x70] sm:$0xff]  }
  0x3c   :  { %1663 = vmatmul.mubr.msk.bf16.vlgmr.msra.gmra.mrb[0].mxu0 %vm114_vm1, %v2181_v2  ;;  %v1921_v27 = vld [vmem:[#allocation7 + $0x78] sm:$0xff]   ;;  %v2212_v31 = vld [vmem:[%s2354_s3] sm:$0xff]  ;;  %v1922_v54 = vld [vmem:[#allocation7 + $0x80] sm:$0xff]  }
  0x3d   :  { %1702 = vmatprep.mubr.msk.bf16.mxu0 %vm2091_vm0, %v2090_v0  ;;  %1669 = vmatpush3.bf16.msra.mxu1 %v1907_v4  ;;  %v163_v32 = vrot.slane %v2212_v31, %v162_v30  ;;  %v259_v43 = vrot.slane %v2212_v31, %v258_v42  ;;  %v2222_v53 = vld [vmem:[%s2355_s4] sm:$0xf]  ;;  %v1923_v55 = vld [vmem:[#allocation7 + $0x88] sm:$0xff]   ;;  %v1925_v57 = vld [vmem:[#allocation7 + $0x98] sm:$0xff]   ;;  %s2092_s4 = smov [#allocation8]  }
  0x3e   :  { %1670 = vmatprep.subr.bf16.mxu1 %v2090_v0  ;;  %1687 = vmatpush3.bf16.msra.mxu0 %v1914_v11  ;;  %v1924_v56 = vld [vmem:[#allocation7 + $0x90] sm:$0xff]   ;;  %v1926_v58 = vld [vmem:[#allocation7 + $0xa0] sm:$0xff]   ;;  %v1927_v59 = vld [vmem:[#allocation7 + $0xa8] sm:$0xff]   ;;  %s1460_s6 = sshll.u32 %s2092_s4, 4  ;;  %s1461_s6 = int_to_ptr.vmem [resolvable:$true] %s1460_s6 }
  0x3f   :  { %1688 = vmatprep.subr.bf16.mxu0 %v2090_v0  ;;  %v1928_v60 = vld [vmem:[#allocation7 + $0xb0] sm:$0xff]   ;;  %v1929_v61 = vld [vmem:[#allocation7 + $0xb8] sm:$0xff]   ;;  %v1930_v62 = vld [vmem:[#allocation7 + $0xc0] sm:$0xff]   ;;  %s2057_s7 = scalar_lea.vmem %s1461_s6, 128  ;;  %p2062_p11 = scmp.lt.s32.totalorder %s1461_s6, %s1461_s6 }
  0x40   :  { %v1931_v63 = vld [vmem:[#allocation7 + $0xc8] sm:$0xff]   ;;  %v1932_v1 = vld [vmem:[#allocation7 + $0xd0] sm:$0xff]   ;;  %v1933_v3 = vld [vmem:[#allocation7 + $0xd8] sm:$0xff]   ;;  %p2058_p10 = scmp.ne.s32.totalorder %s1461_s6, %s2057_s7  ;;  %p2063_p12 = scmp.lt.s32.totalorder %s2057_s7, %s2057_s7 }
  0x41   :  { %1671 = vmatpush3.bf16.msra.mxu1 %v1908_v5  ;;  %v1934_v4 = vld [vmem:[#allocation7 + $0xe0] sm:$0xff]   ;;  %v1935_v5 = vld [vmem:[#allocation7 + $0xe8] sm:$0xff]  }
  0x42   :  { %1672 = vmatprep.subr.bf16.mxu1 %v2090_v0  ;;  %1689 = vmatpush3.bf16.msra.mxu0 %v1915_v12  ;;  %p2064_p13 = por %p2063_p12, %p2062_p11 }
  0x43   :  { %1690 = vmatprep.subr.bf16.mxu0 %v2090_v0 }
  0x44   :  { %p2065_p0 = pnand %p2064_p13, %p2058_p10 }
  0x45   :  { %1673 = vmatpush3.bf16.msra.mxu1 %v1909_v6 }
  0x46   :  { %1674 = vmatprep.subr.bf16.mxu1 %v2090_v0  ;;  %1691 = vmatpush3.bf16.msra.mxu0 %v1916_v13 }
  0x47   :  { %1692 = vmatprep.subr.bf16.mxu0 %v2090_v0 }
  0x49   :  { %1675 = vmatpush3.bf16.msra.mxu1 %v1910_v7 }
  0x4a   :  { %1676 = vmatprep.subr.bf16.mxu1 %v2090_v0  ;;  %1693 = vmatpush3.bf16.msra.mxu0 %v1917_v14 }
  0x4b   :  { %1694 = vmatprep.subr.bf16.mxu0 %v2090_v0 }
  0x4d   :  { %1677 = vmatpush3.bf16.msra.mxu1 %v1911_v8 }
  0x4e   :  { %1678 = vmatprep.subr.bf16.mxu1 %v2090_v0  ;;  %1695 = vmatpush3.bf16.msra.mxu0 %v1918_v15 }
  0x4f   :  { %1696 = vmatprep.subr.bf16.mxu0 %v2090_v0 }
  0x51   :  { %1679 = vmatpush3.bf16.msra.mxu1 %v1912_v9 }
  0x52   :  { %1680 = vmatprep.subr.bf16.mxu1 %v2090_v0  ;;  %1697 = vmatpush3.bf16.msra.mxu0 %v1919_v16 }
  0x53   :  { %1698 = vmatprep.subr.bf16.mxu0 %v2090_v0 }
  0x55   :  { %1681 = vmatpush3.bf16.msra.mxu1 %v1913_v10 }
  0x56   :  { %1706 = vmatprep.subr.bf16.mxu1 %v2090_v0  ;;  %1699 = vmatpush3.bf16.msra.mxu0 %v1920_v26 }
  0x57   :  { %1700 = vmatprep.subr.bf16.mxu0 %v2090_v0 }
  0x5a   :  { %1701 = vmatpush3.bf16.msra.mxu0 %v1921_v27 }
  0x5b   :  { %1712 = vmatprep.subr.bf16.mxu0 %v2090_v0 }
 0x10f   :  { %v152_v19 = vpop.f32.mrb[0].mxu0 }
 0x110   :  { %v1664_v20 = vpop.f32.mrb[1].mxu0  ;;  %v153_v22 = vadd.f32 %v152_v19, %v101_v17  ;;  %v1936_v19 = vld [vmem:[#allocation7 + $0xf0] sm:$0xff]  }
 0x111   :  { %v155_v21 = vpop.f32.mrb[2].mxu0  ;;  %v1937_v20 = vld [vmem:[#allocation7 + $0xf8] sm:$0xff]  }
 0x112   :  { %v156_v23 = vadd.f32 %v155_v21, %v102_v18  ;;  %v1665_v24 = vpop.f32.mrb[3].mxu0  ;;  %v473_v21 = vsub.s32 2, %v2206_v29 }
 0x114   :  { %v159_v25 = vpack.c.bf16 %v156_v23, %v153_v22  ;;  %v474_v22 = vrot.slane %v2212_v31, %v473_v21 }
 0x116   :  { %1683 = vmatmul.mubr.bf16.vlgmr.msra.gmra.mrb[0].mxu1 %v159_v25 }
 0x117   :  { %1708 = vmatprep.mubr.msk.bf16.mxu1 %vm2091_vm0, %v2090_v0 }
 0x1e9   :  { %v246_v33 = vpop.f32.mrb[0].mxu1 }
 0x1ea   :  { %v247_v34 = vadd.f32 %v246_v33, %v163_v32  ;;  %v1684_v35 = vpop.f32.mrb[1].mxu1 }
 0x1eb   :  { %v249_v36 = vpop.f32.mrb[2].mxu1 }
 0x1ec   :  { %v250_v37 = vadd.f32 %v249_v36, %v163_v32  ;;  %v1685_v38 = vpop.f32.mrb[3].mxu1  ;;  %v253_v39 = vmax.f32 %v247_v34, 0.0  ;;  %v569_v34 = vsub.s32 3, %v2206_v29 }
 0x1ee   :  { %v254_v40 = vmax.f32 %v250_v37, 0.0  ;;  %v570_v35 = vrot.slane %v2212_v31, %v569_v34 }
 0x1f0   :  { %v255_v41 = vpack.c.bf16 %v254_v40, %v253_v39 }
 0x1f2   :  { %1703 = vmatmul.mubr.bf16.vlgmr.msra.gmra.mrb[4].mxu0 %v255_v41 }
 0x1f3   :  { %1714 = vmatprep.mubr.msk.bf16.mxu0 %vm2091_vm0, %v2090_v0 }
 0x2c5   :  { %v342_v44 = vpop.f32.mrb[4].mxu0 }
 0x2c6   :  { %v343_v45 = vadd.f32 %v342_v44, %v259_v43  ;;  %v1704_v46 = vpop.f32.mrb[5].mxu0 }
 0x2c7   :  { %v345_v47 = vpop.f32.mrb[6].mxu0  ;;  %v1939_v46 = vld [vmem:[#allocation7 + $0x108] sm:$0xff]  }
 0x2c8   :  { %v346_v48 = vadd.f32 %v345_v47, %v259_v43  ;;  %v1705_v49 = vpop.f32.mrb[7].mxu0  ;;  %v349_v50 = vmax.f32 %v343_v45, 0.0  ;;  %v1938_v45 = vld [vmem:[#allocation7 + $0x100] sm:$0xff]   ;;  %v1940_v47 = vld [vmem:[#allocation7 + $0x110] sm:$0xff]  }
 0x2c9   :  { %v1943_v49 = vld [vmem:[#allocation7 + $0x128] sm:$0xff]  }
 0x2ca   :  { %v350_v51 = vmax.f32 %v346_v48, 0.0  ;;  %v1941_v48 = vld [vmem:[#allocation7 + $0x118] sm:$0xff]  }
 0x2cc   :  { %v351_v52 = vpack.c.bf16 %v350_v51, %v349_v50  ;;  %v1944_v50 = vld [vmem:[#allocation7 + $0x130] sm:$0xff]   ;;  %v1945_v51 = vld [vmem:[#allocation7 + $0x138] sm:$0xff]  }
 0x2ce   :  { %1707 = vmatpush3.bf16.msra.mxu1 %v351_v52  ;;  %1713 = vmatpush3.bf16.msra.mxu0 %v351_v52  ;;  %v427_v6 = vunpack.c.l.bf16 %v351_v52  ;;  %v428_v11 = vunpack.c.h.bf16 %v351_v52  ;;  %v1946_v52 = vld [vmem:[#allocation7 + $0x140] sm:$0xff]  }
 0x2cf   :  { %1718 = vmatprep.subr.bf16.mxu1 %v2090_v0  ;;  %1738 = vmatprep.subr.bf16.mxu0 %v2090_v0 }
 0x2d1   :  { %1715 = vmatmul.mubr.msk.bf16.vlgmr.msra.gmra.mrb[8].mxu0 %vm114_vm1, %v2181_v2  ;;  %1709 = vmatmul.mubr.msk.bf16.vlgmr.msra.gmra.mrb[4].mxu1 %vm114_vm1, %v2222_v53 }
 0x2d2   :  { %1719 = vmatpush3.bf16.msra.mxu1 %v1922_v54  ;;  %1734 = vmatprep.mubr.msk.bf16.mxu1 %vm2091_vm0, %v2090_v0  ;;  %v1947_v54 = vld [vmem:[#allocation7 + $0x148] sm:$0xff]  }
 0x2d3   :  { %1720 = vmatprep.subr.bf16.mxu1 %v2090_v0  ;;  %1754 = vmatprep.mubr.msk.bf16.mxu0 %vm2091_vm0, %v2090_v0 }
 0x2d4   :  { %1739 = vmatpush3.bf16.msra.mxu0 %v1930_v62 }
 0x2d5   :  { %1740 = vmatprep.subr.bf16.mxu0 %v2090_v0 }
 0x2d6   :  { %1721 = vmatpush3.bf16.msra.mxu1 %v1923_v55  ;;  %v1948_v55 = vld [vmem:[#allocation7 + $0x150] sm:$0xff]  }
 0x2d7   :  { %1722 = vmatprep.subr.bf16.mxu1 %v2090_v0 }
 0x2d8   :  { %1741 = vmatpush3.bf16.msra.mxu0 %v1931_v63 }
 0x2d9   :  { %1742 = vmatprep.subr.bf16.mxu0 %v2090_v0 }
 0x2da   :  { %1723 = vmatpush3.bf16.msra.mxu1 %v1924_v56  ;;  %v1949_v56 = vld [vmem:[#allocation7 + $0x158] sm:$0xff]  }
 0x2db   :  { %1724 = vmatprep.subr.bf16.mxu1 %v2090_v0 }
 0x2dc   :  { %1743 = vmatpush3.bf16.msra.mxu0 %v1932_v1 }
 0x2dd   :  { %1744 = vmatprep.subr.bf16.mxu0 %v2090_v0 }
 0x2de   :  { %1725 = vmatpush3.bf16.msra.mxu1 %v1925_v57  ;;  %v1950_v57 = vld [vmem:[#allocation7 + $0x160] sm:$0xff]  }
 0x2df   :  { %1726 = vmatprep.subr.bf16.mxu1 %v2090_v0 }
 0x2e0   :  { %1745 = vmatpush3.bf16.msra.mxu0 %v1933_v3 }
 0x2e1   :  { %1746 = vmatprep.subr.bf16.mxu0 %v2090_v0 }
 0x2e2   :  { %1727 = vmatpush3.bf16.msra.mxu1 %v1926_v58  ;;  %v1951_v58 = vld [vmem:[#allocation7 + $0x168] sm:$0xff]  }
 0x2e3   :  { %1728 = vmatprep.subr.bf16.mxu1 %v2090_v0 }
 0x2e4   :  { %1747 = vmatpush3.bf16.msra.mxu0 %v1934_v4 }
 0x2e5   :  { %1748 = vmatprep.subr.bf16.mxu0 %v2090_v0 }
 0x2e6   :  { %1729 = vmatpush3.bf16.msra.mxu1 %v1927_v59 }
 0x2e7   :  { %1730 = vmatprep.subr.bf16.mxu1 %v2090_v0 }
 0x2e8   :  { %1749 = vmatpush3.bf16.msra.mxu0 %v1935_v5 }
 0x2e9   :  { %1750 = vmatprep.subr.bf16.mxu0 %v2090_v0 }
 0x2ea   :  { %1731 = vmatpush3.bf16.msra.mxu1 %v1928_v60 }
 0x2eb   :  { %1732 = vmatprep.subr.bf16.mxu1 %v2090_v0 }
 0x2ec   :  { %1751 = vmatpush3.bf16.msra.mxu0 %v1936_v19 }
 0x2ed   :  { %1752 = vmatprep.subr.bf16.mxu0 %v2090_v0 }
 0x2ee   :  { %1733 = vmatpush3.bf16.msra.mxu1 %v1929_v61 }
 0x2ef   :  { %1758 = vmatprep.subr.bf16.mxu1 %v2090_v0 }
 0x2f0   :  { %1753 = vmatpush3.bf16.msra.mxu0 %v1937_v20 }
 0x2f1   :  { %1764 = vmatprep.subr.bf16.mxu0 %v2090_v0 }
 0x3a4   :  { %v463_v7 = vpop.f32.mrb[8].mxu0  ;;  %v2248_v8 = vpop.f32.mrb[4].mxu1 }
 0x3a5   :  { %v464_v9 = vadd.f32 %v463_v7, %v427_v6  ;;  %v1716_v10 = vpop.f32.mrb[9].mxu0  ;;  %v1710_v12 = vpop.f32.mrb[5].mxu1 }
 0x3a6   :  { %v466_v13 = vpop.f32.mrb[10].mxu0  ;;  %v392_v14 = vpop.f32.mrb[6].mxu1  ;;  %v1953_v12 = vld [vmem:[#allocation7 + $0x178] sm:$0xff]  }
 0x3a7   :  { %v467_v15 = vadd.f32 %v466_v13, %v428_v11  ;;  %v1717_v16 = vpop.f32.mrb[11].mxu0  ;;  %v1711_v17 = vpop.f32.mrb[7].mxu1  ;;  %v1952_v11 = vld [vmem:[#allocation7 + $0x170] sm:$0xff]   ;;  %v781_v13 = vsub.s32 4, %v2206_v29 }
 0x3a9   :  { %v470_v18 = vpack.c.bf16 %v467_v15, %v464_v9  ;;  %v782_v14 = vrot.slane %v2212_v31, %v781_v13 }
 0x3ab   :  { %1735 = vmatmul.mubr.bf16.vlgmr.msra.gmra.mrb[8].mxu1 %v470_v18 }
 0x3ac   :  { %1760 = vmatprep.mubr.msk.bf16.mxu1 %vm2091_vm0, %v2090_v0 }
 0x47e   :  { %v557_v23 = vpop.f32.mrb[8].mxu1 }
 0x47f   :  { %v558_v24 = vadd.f32 %v557_v23, %v474_v22  ;;  %v1736_v25 = vpop.f32.mrb[9].mxu1  ;;  %v1954_v23 = vld [vmem:[#allocation7 + $0x1c0] sm:$0xff]  }
 0x480   :  { %v560_v26 = vpop.f32.mrb[10].mxu1  ;;  %v1955_v25 = vld [vmem:[#allocation7 + $0x1c8] sm:$0xff]  }
 0x481   :  { %v561_v27 = vadd.f32 %v560_v26, %v474_v22  ;;  %v1737_v28 = vpop.f32.mrb[11].mxu1  ;;  %v564_v30 = vmax.f32 %v558_v24, 0.0  ;;  %v1956_v26 = vld [vmem:[#allocation7 + $0x1d0] sm:$0xff]  }
 0x482   :  { %v1958_v28 = vld [vmem:[#allocation7 + $0x1e0] sm:$0xff]  }
 0x483   :  { %v565_v32 = vmax.f32 %v561_v27, 0.0  ;;  %v1957_v27 = vld [vmem:[#allocation7 + $0x1d8] sm:$0xff]  }
 0x485   :  { %v566_v33 = vpack.c.bf16 %v565_v32, %v564_v30  ;;  %v1959_v30 = vld [vmem:[#allocation7 + $0x1e8] sm:$0xff]   ;;  %v1960_v32 = vld [vmem:[#allocation7 + $0x1f0] sm:$0xff]  }
 0x487   :  { %1755 = vmatmul.mubr.bf16.vlgmr.msra.gmra.mrb[12].mxu0 %v566_v33  ;;  %v1961_v33 = vld [vmem:[#allocation7 + $0x1f8] sm:$0xff]  }
 0x488   :  { %1766 = vmatprep.mubr.msk.bf16.mxu0 %vm2091_vm0, %v2090_v0 }
 0x55a   :  { %v653_v36 = vpop.f32.mrb[12].mxu0 }
 0x55b   :  { %v654_v37 = vadd.f32 %v653_v36, %v570_v35  ;;  %v1756_v38 = vpop.f32.mrb[13].mxu0  ;;  %v1971_v36 = vld [vmem:[#allocation7 + $0x208] sm:$0xff]  }
 0x55c   :  { %v656_v39 = vpop.f32.mrb[14].mxu0  ;;  %v1973_v38 = vld [vmem:[#allocation7 + $0x218] sm:$0xff]  }
 0x55d   :  { %v657_v40 = vadd.f32 %v656_v39, %v570_v35  ;;  %v1757_v41 = vpop.f32.mrb[15].mxu0  ;;  %v660_v42 = vmax.f32 %v654_v37, 0.0  ;;  %v1970_v35 = vld [vmem:[#allocation7 + $0x200] sm:$0xff]   ;;  %v1972_v37 = vld [vmem:[#allocation7 + $0x210] sm:$0xff]  }
 0x55e   :  { %v1974_v39 = vld [vmem:[#allocation7 + $0x220] sm:$0xff]   ;;  %v1976_v41 = vld [vmem:[#allocation7 + $0x230] sm:$0xff]  }
 0x55f   :  { %v661_v43 = vmax.f32 %v657_v40, 0.0  ;;  %v1975_v40 = vld [vmem:[#allocation7 + $0x228] sm:$0xff]  }
 0x561   :  { %v662_v44 = vpack.c.bf16 %v661_v43, %v660_v42  ;;  %v877_v42 = vsub.s32 5, %v2206_v29 }
 0x563   :  { %1759 = vmatpush3.bf16.msra.mxu1 %v662_v44  ;;  %1765 = vmatpush3.bf16.msra.mxu0 %v662_v44  ;;  %v735_v59 = vunpack.c.l.bf16 %v662_v44  ;;  %v736_v1 = vunpack.c.h.bf16 %v662_v44  ;;  %v878_v43 = vrot.slane %v2212_v31, %v877_v42 }
 0x564   :  { %1770 = vmatprep.subr.bf16.mxu1 %v2090_v0  ;;  %1790 = vmatprep.subr.bf16.mxu0 %v2090_v0 }
 0x566   :  { %1767 = vmatmul.mubr.msk.bf16.vlgmr.msra.gmra.mrb[16].mxu0 %vm114_vm1, %v2181_v2  ;;  %1761 = vmatmul.mubr.msk.bf16.vlgmr.msra.gmra.mrb[12].mxu1 %vm114_vm1, %v2222_v53  ;;  %v1942_v2 = vld [vmem:[#allocation7 + $0x120] sm:$0xff]  }
 0x567   :  { %1771 = vmatpush3.bf16.msra.mxu1 %v1938_v45  ;;  %1786 = vmatprep.mubr.msk.bf16.mxu1 %vm2091_vm0, %v2090_v0 }
 0x568   :  { %1772 = vmatprep.subr.bf16.mxu1 %v2090_v0  ;;  %1806 = vmatprep.mubr.msk.bf16.mxu0 %vm2091_vm0, %v2090_v0 }
 0x569   :  { %1791 = vmatpush3.bf16.msra.mxu0 %v1946_v52  ;;  %v1962_v52 = vld [vmem:[#allocation7 + $0x180] sm:$0xff]  }
 0x56a   :  { %1792 = vmatprep.subr.bf16.mxu0 %v2090_v0 }
 0x56b   :  { %1773 = vmatpush3.bf16.msra.mxu1 %v1939_v46 }
 0x56c   :  { %1774 = vmatprep.subr.bf16.mxu1 %v2090_v0 }
 0x56d   :  { %1793 = vmatpush3.bf16.msra.mxu0 %v1947_v54  ;;  %v1963_v54 = vld [vmem:[#allocation7 + $0x188] sm:$0xff]  }
 0x56e   :  { %1794 = vmatprep.subr.bf16.mxu0 %v2090_v0 }
 0x56f   :  { %1775 = vmatpush3.bf16.msra.mxu1 %v1940_v47 }
 0x570   :  { %1776 = vmatprep.subr.bf16.mxu1 %v2090_v0 }
 0x571   :  { %1795 = vmatpush3.bf16.msra.mxu0 %v1948_v55  ;;  %v1964_v55 = vld [vmem:[#allocation7 + $0x190] sm:$0xff]  }
 0x572   :  { %1796 = vmatprep.subr.bf16.mxu0 %v2090_v0 }
 0x573   :  { %1777 = vmatpush3.bf16.msra.mxu1 %v1941_v48 }
 0x574   :  { %1778 = vmatprep.subr.bf16.mxu1 %v2090_v0 }
 0x575   :  { %1797 = vmatpush3.bf16.msra.mxu0 %v1949_v56  ;;  %v1965_v56 = vld [vmem:[#allocation7 + $0x198] sm:$0xff]  }
 0x576   :  { %1798 = vmatprep.subr.bf16.mxu0 %v2090_v0 }
 0x577   :  { %1779 = vmatpush3.bf16.msra.mxu1 %v1942_v2 }
 0x578   :  { %1780 = vmatprep.subr.bf16.mxu1 %v2090_v0 }
 0x579   :  { %1799 = vmatpush3.bf16.msra.mxu0 %v1950_v57  ;;  %v1966_v57 = vld [vmem:[#allocation7 + $0x1a0] sm:$0xff]  }
 0x57a   :  { %1800 = vmatprep.subr.bf16.mxu0 %v2090_v0 }
 0x57b   :  { %1781 = vmatpush3.bf16.msra.mxu1 %v1943_v49 }
 0x57c   :  { %1782 = vmatprep.subr.bf16.mxu1 %v2090_v0 }
 0x57d   :  { %1801 = vmatpush3.bf16.msra.mxu0 %v1951_v58 }
 0x57e   :  { %1802 = vmatprep.subr.bf16.mxu0 %v2090_v0 }
 0x57f   :  { %1783 = vmatpush3.bf16.msra.mxu1 %v1944_v50 }
 0x580   :  { %1784 = vmatprep.subr.bf16.mxu1 %v2090_v0 }
 0x581   :  { %1803 = vmatpush3.bf16.msra.mxu0 %v1952_v11 }
 0x582   :  { %1804 = vmatprep.subr.bf16.mxu0 %v2090_v0 }
 0x583   :  { %1785 = vmatpush3.bf16.msra.mxu1 %v1945_v51 }
 0x584   :  { %1810 = vmatprep.subr.bf16.mxu1 %v2090_v0 }
 0x585   :  { %1805 = vmatpush3.bf16.msra.mxu0 %v1953_v12 }
 0x586   :  { %1816 = vmatprep.subr.bf16.mxu0 %v2090_v0 }
 0x639   :  { %v771_v60 = vpop.f32.mrb[16].mxu0  ;;  %v697_v61 = vpop.f32.mrb[12].mxu1 }
 0x63a   :  { %v772_v62 = vadd.f32 %v771_v60, %v735_v59  ;;  %v1768_v63 = vpop.f32.mrb[17].mxu0  ;;  %v1762_v3 = vpop.f32.mrb[13].mxu1  ;;  %v1028_v34 = vpack.c.bf16 %v697_v61, %v697_v61  ;;  %v1968_v60 = vld [vmem:[#allocation7 + $0x1b0] sm:$0xff]  }
 0x63b   :  { %v774_v4 = vpop.f32.mrb[18].mxu0  ;;  %v700_v5 = vpop.f32.mrb[14].mxu1  ;;  %v1969_v63 = vld [vmem:[#allocation7 + $0x1b8] sm:$0xff]  }
 0x63c   :  { %v775_v6 = vadd.f32 %v774_v4, %v736_v1  ;;  %v1769_v7 = vpop.f32.mrb[19].mxu0  ;;  %v1763_v9 = vpop.f32.mrb[15].mxu1  ;;  %v1011_v1 = vpack.c.bf16 %v2248_v8, %v2248_v8  ;;  %v1977_v3 = vld [vmem:[#allocation7 + $0x238] sm:$0xff]   ;;  %v1978_v4 = vld [vmem:[#allocation7 + $0x240] sm:$0xff]   ;;  %v1979_v5 = vld [vmem:[#allocation7 + $0x248] sm:$0xff]  }
 0x63d   :  { %v1981_v7 = vld [vmem:[#allocation7 + $0x258] sm:$0xff]   ;;  %v1982_v8 = vld [vmem:[#allocation7 + $0x260] sm:$0xff]   ;;  %v1983_v9 = vld [vmem:[#allocation7 + $0x268] sm:$0xff]  }
 0x63e   :  { %v778_v10 = vpack.c.bf16 %v775_v6, %v772_v62  ;;  %v1980_v6 = vld [vmem:[#allocation7 + $0x250] sm:$0xff]  }
 0x640   :  { %1787 = vmatmul.mubr.bf16.vlgmr.msra.gmra.mrb[16].mxu1 %v778_v10 }
 0x641   :  { %1812 = vmatprep.mubr.msk.bf16.mxu1 %vm2091_vm0, %v2090_v0 }
 0x713   :  { %v865_v15 = vpop.f32.mrb[16].mxu1 }
 0x714   :  { %v866_v16 = vadd.f32 %v865_v15, %v782_v14  ;;  %v1788_v17 = vpop.f32.mrb[17].mxu1 }
 0x715   :  { %v868_v18 = vpop.f32.mrb[18].mxu1 }
 0x716   :  { %v869_v19 = vadd.f32 %v868_v18, %v782_v14  ;;  %v1789_v20 = vpop.f32.mrb[19].mxu1  ;;  %v872_v21 = vmax.f32 %v866_v16, 0.0 }
 0x717   :  { %v1984_v20 = vld [vmem:[#allocation7 + $0x270] sm:$0xff]  }
 0x718   :  { %v873_v22 = vmax.f32 %v869_v19, 0.0 }
 0x71a   :  { %v874_v24 = vpack.c.bf16 %v873_v22, %v872_v21  ;;  %v1985_v21 = vld [vmem:[#allocation7 + $0x278] sm:$0xff]   ;;  %v1329_v22 = vsub.s32 6, %v2206_v29 }
 0x71c   :  { %1807 = vmatmul.mubr.bf16.vlgmr.msra.gmra.mrb[20].mxu0 %v874_v24 }
 0x71d   :  { %1817 = vmatpush3.bf16.msra.mxu0 %v1954_v23  ;;  %1832 = vmatprep.mubr.msk.bf16.mxu0 %vm2091_vm0, %v2090_v0  ;;  %v1330_v23 = vrot.slane %v2212_v31, %v1329_v22 }
 0x71e   :  { %1818 = vmatprep.subr.bf16.mxu0 %v2090_v0 }
 0x721   :  { %1819 = vmatpush3.bf16.msra.mxu0 %v1955_v25 }
 0x722   :  { %1820 = vmatprep.subr.bf16.mxu0 %v2090_v0 }
 0x725   :  { %1821 = vmatpush3.bf16.msra.mxu0 %v1956_v26 }
 0x726   :  { %1822 = vmatprep.subr.bf16.mxu0 %v2090_v0 }
 0x729   :  { %1823 = vmatpush3.bf16.msra.mxu0 %v1957_v27 }
 0x72a   :  { %1824 = vmatprep.subr.bf16.mxu0 %v2090_v0 }
 0x72d   :  { %1825 = vmatpush3.bf16.msra.mxu0 %v1958_v28 }
 0x72e   :  { %1826 = vmatprep.subr.bf16.mxu0 %v2090_v0 }
 0x731   :  { %1827 = vmatpush3.bf16.msra.mxu0 %v1959_v30 }
 0x732   :  { %1828 = vmatprep.subr.bf16.mxu0 %v2090_v0 }
 0x735   :  { %1829 = vmatpush3.bf16.msra.mxu0 %v1960_v32 }
 0x736   :  { %1830 = vmatprep.subr.bf16.mxu0 %v2090_v0 }
 0x739   :  { %1831 = vmatpush3.bf16.msra.mxu0 %v1961_v33 }
 0x73a   :  { %1856 = vmatprep.subr.bf16.mxu0 %v2090_v0 }
 0x73c   :  { %1833 = vmatmul.mubr.bf16.vlgmr.msra.gmra.mrb[24].mxu0 %v1028_v34  ;;  %v1352_v34 = vsub.s32 7, %v2206_v29 }
 0x73d   :  { %1872 = vmatprep.mubr.msk.bf16.mxu0 %vm2091_vm0, %v2090_v0  ;;  %1857 = vmatpush3.bf16.msra.mxu0 %v1970_v35 }
 0x73e   :  { %1858 = vmatprep.subr.bf16.mxu0 %v2090_v0  ;;  %v1353_v35 = vrot.slane %v2212_v31, %v1352_v34 }
 0x741   :  { %1859 = vmatpush3.bf16.msra.mxu0 %v1971_v36 }
 0x742   :  { %1860 = vmatprep.subr.bf16.mxu0 %v2090_v0 }
 0x745   :  { %1861 = vmatpush3.bf16.msra.mxu0 %v1972_v37 }
 0x746   :  { %1862 = vmatprep.subr.bf16.mxu0 %v2090_v0 }
 0x749   :  { %1863 = vmatpush3.bf16.msra.mxu0 %v1973_v38 }
 0x74a   :  { %1864 = vmatprep.subr.bf16.mxu0 %v2090_v0 }
 0x74d   :  { %1865 = vmatpush3.bf16.msra.mxu0 %v1974_v39 }
 0x74e   :  { %1866 = vmatprep.subr.bf16.mxu0 %v2090_v0 }
 0x751   :  { %1867 = vmatpush3.bf16.msra.mxu0 %v1975_v40 }
 0x752   :  { %1868 = vmatprep.subr.bf16.mxu0 %v2090_v0 }
 0x755   :  { %1869 = vmatpush3.bf16.msra.mxu0 %v1976_v41 }
 0x756   :  { %1870 = vmatprep.subr.bf16.mxu0 %v2090_v0 }
 0x759   :  { %1871 = vmatpush3.bf16.msra.mxu0 %v1977_v3 }
 0x7ef   :  { %v961_v44 = vpop.f32.mrb[20].mxu0 }
 0x7f0   :  { %v962_v45 = vadd.f32 %v961_v44, %v878_v43  ;;  %v1808_v46 = vpop.f32.mrb[21].mxu0 }
 0x7f1   :  { %v964_v47 = vpop.f32.mrb[22].mxu0 }
 0x7f2   :  { %v965_v48 = vadd.f32 %v964_v47, %v878_v43  ;;  %v1809_v2 = vpop.f32.mrb[23].mxu0  ;;  %v968_v49 = vmax.f32 %v962_v45, 0.0 }
 0x7f4   :  { %v969_v50 = vmax.f32 %v965_v48, 0.0 }
 0x7f6   :  { %v970_v51 = vpack.c.bf16 %v969_v50, %v968_v49 }
 0x7f8   :  { %1811 = vmatpush3.bf16.msra.mxu1 %v970_v51 }
 0x7f9   :  { %1836 = vmatprep.subr.bf16.mxu1 %v2090_v0 }
 0x7fb   :  { %1813 = vmatmul.mubr.msk.bf16.vlgmr.msra.gmra.mrb[20].mxu1 %vm114_vm1, %v2222_v53  ;;  %v1967_v53 = vld [vmem:[#allocation7 + $0x1a8] sm:$0xff]  }
 0x7fc   :  { %1837 = vmatpush3.bf16.msra.mxu1 %v1962_v52  ;;  %1852 = vmatprep.mubr.msk.bf16.mxu1 %vm2091_vm0, %v2090_v0 }
 0x7fd   :  { %1838 = vmatprep.subr.bf16.mxu1 %v2090_v0 }
 0x800   :  { %1839 = vmatpush3.bf16.msra.mxu1 %v1963_v54 }
 0x801   :  { %1840 = vmatprep.subr.bf16.mxu1 %v2090_v0 }
 0x804   :  { %1841 = vmatpush3.bf16.msra.mxu1 %v1964_v55 }
 0x805   :  { %1842 = vmatprep.subr.bf16.mxu1 %v2090_v0 }
 0x808   :  { %1843 = vmatpush3.bf16.msra.mxu1 %v1965_v56 }
 0x809   :  { %1844 = vmatprep.subr.bf16.mxu1 %v2090_v0 }
 0x80c   :  { %1845 = vmatpush3.bf16.msra.mxu1 %v1966_v57 }
 0x80d   :  { %1846 = vmatprep.subr.bf16.mxu1 %v2090_v0 }
 0x80f   :  { %v1127_v58 = vpop.f32.mrb[24].mxu0 }
 0x810   :  { %v1834_v59 = vpop.f32.mrb[25].mxu0  ;;  %1847 = vmatpush3.bf16.msra.mxu1 %v1967_v53 }
 0x811   :  { %v1130_v61 = vpop.f32.mrb[26].mxu0  ;;  %1848 = vmatprep.subr.bf16.mxu1 %v2090_v0 }
 0x812   :  { %v1835_v62 = vpop.f32.mrb[27].mxu0 }
 0x814   :  { %1849 = vmatpush3.bf16.msra.mxu1 %v1968_v60 }
 0x815   :  { %1850 = vmatprep.subr.bf16.mxu1 %v2090_v0 }
 0x818   :  { %1851 = vmatpush3.bf16.msra.mxu1 %v1969_v63 }
 0x819   :  { %1876 = vmatprep.subr.bf16.mxu1 %v2090_v0 }
 0x81b   :  { %1853 = vmatmul.mubr.bf16.vlgmr.msra.gmra.mrb[24].mxu1 %v1011_v1 }
 0x81c   :  { %1892 = vmatprep.mubr.msk.bf16.mxu1 %vm2091_vm0, %v2090_v0  ;;  %1877 = vmatpush3.bf16.msra.mxu1 %v1978_v4 }
 0x81d   :  { %1878 = vmatprep.subr.bf16.mxu1 %v2090_v0 }
 0x820   :  { %1879 = vmatpush3.bf16.msra.mxu1 %v1979_v5 }
 0x821   :  { %1880 = vmatprep.subr.bf16.mxu1 %v2090_v0 }
 0x824   :  { %1881 = vmatpush3.bf16.msra.mxu1 %v1980_v6 }
 0x825   :  { %1882 = vmatprep.subr.bf16.mxu1 %v2090_v0 }
 0x828   :  { %1883 = vmatpush3.bf16.msra.mxu1 %v1981_v7 }
 0x829   :  { %1884 = vmatprep.subr.bf16.mxu1 %v2090_v0 }
 0x82c   :  { %1885 = vmatpush3.bf16.msra.mxu1 %v1982_v8 }
 0x82d   :  { %1886 = vmatprep.subr.bf16.mxu1 %v2090_v0 }
 0x830   :  { %1887 = vmatpush3.bf16.msra.mxu1 %v1983_v9 }
 0x831   :  { %1888 = vmatprep.subr.bf16.mxu1 %v2090_v0 }
 0x834   :  { %1889 = vmatpush3.bf16.msra.mxu1 %v1984_v20 }
 0x835   :  { %1890 = vmatprep.subr.bf16.mxu1 %v2090_v0 }
 0x838   :  { %1891 = vmatpush3.bf16.msra.mxu1 %v1985_v21 }
 0x8ce   :  { %v1005_v10 = vpop.f32.mrb[20].mxu1 }
 0x8cf   :  { %v1221_v11 = vpack.c.bf16 %v1005_v10, %v1005_v10  ;;  %v1814_v12 = vpop.f32.mrb[21].mxu1 }
 0x8d0   :  { %v1008_v13 = vpop.f32.mrb[22].mxu1 }
 0x8d1   :  { %1873 = vmatmul.mubr.bf16.vlgmr.msra.gmra.mrb[28].mxu0 %v1221_v11  ;;  %v1815_v14 = vpop.f32.mrb[23].mxu1 }
 0x8ee   :  { %v1215_v15 = vpop.f32.mrb[24].mxu1 }
 0x8ef   :  { %v1216_v16 = vadd.f32 %v1215_v15, %v1127_v58  ;;  %v1854_v17 = vpop.f32.mrb[25].mxu1 }
 0x8f0   :  { %v1218_v18 = vpop.f32.mrb[26].mxu1 }
 0x8f1   :  { %v1855_v19 = vpop.f32.mrb[27].mxu1 }
 0x9a4   :  { %v1320_v24 = vpop.f32.mrb[28].mxu0 }
 0x9a5   :  { %v1326_v25 = vadd.f32 %v1320_v24, %v1216_v16  ;;  %v1874_v26 = vpop.f32.mrb[29].mxu0 }
 0x9a6   :  { %v1323_v27 = vpop.f32.mrb[30].mxu0 }
 0x9a7   :  { %v1331_v28 = vadd.f32 %v1330_v23, %v1326_v25  ;;  %v1875_v30 = vpop.f32.mrb[31].mxu0 }
 0x9a9   :  { %v1332_v32 = vmax.f32 %v1331_v28, 0.0 }
 0x9ab   :  { %v1333_v33 = vpack.c.bf16 %v1332_v32, %v1332_v32 }
 0x9ad   :  { %1893 = vmatmul.mubr.bf16.vlgmr.msra.gmra.mrb[28].mxu1 %v1333_v33 }
 0xa80   :  { %v1436_v0 = vpop.f32.mrb[28].mxu1 }
 0xa81   :  { %v1437_v36 = vadd.f32 %v1436_v0, %v1353_v35  ;;  %v1894_v37 = vpop.f32.mrb[29].mxu1 }
 0xa82   :  { %v1439_v38 = vpop.f32.mrb[30].mxu1 }
 0xa83   :  { %1442 = vmax.xlane.f32.xlu0 %v1437_v36  ;;  %v1895_v39 = vpop.f32.mrb[31].mxu1 }
 0xb10   :  { %v1443_v40 = vpop.xlane.xlu0 %1442 }
 0xb11   :  { %v1444_v41 = vsub.f32 %v1437_v36, %v1443_v40 }
 0xb13   :  { %v1445_v42 = vmul.f32 1.442695, %v1444_v41 }
 0xb15   :  { %1987 = vpow2.f32 %v1445_v42 }
 0xb1f   :  { %v1988_v43 = vpop.eup %1987 }
 0xb20   :  { %1447 = vadd.xlane.f32.xlu0 %v1988_v43 }
 0xbad   :  { %v1448_v44 = vpop.xlane.xlu0 %1447 }
 0xbae   :  { %1989 = vlog2.f32 %v1448_v44 }
 0xbb8   :  { %v1990_v45 = vpop.eup %1989 }
 0xbb9   :  { %v1450_v46 = vmul.f32 0.6931472, %v1990_v45 }
 0xbbb   :  { %v1451_v29 = vadd.f32 %v1450_v46, %v1443_v40 }
 0xbbd   :  { %v1452_v31 = vsub.f32 %v1437_v36, %v1451_v29 }
 0xbbf   :  { %1453 = vst [vmem:[#allocation8] sm:$0xff] %v1452_v31 }
 0xbc0   :  { %2068 = shalt.err (!%p2065_p0)
}
 0xbc1   :  { %s2069_s10 = scalar_lea.hbm %s2356_s5, 128 }
 0xbc2   :  { %p2070_p1 = scmp.ne.s32.totalorder %s2356_s5, %s2069_s10  ;;  %p2073_p2 = scmp.lt.u32.totalorder %s2069_s10, %s2356_s5 }
 0xbc4   :  { %p2075_p3 = pnand %p2073_p2, %p2070_p1 }
 0xbc6   :  { %2078 = shalt.err (!%p2075_p3)
}
 0xbc7   :  { %1463 = dma.vmem_to_hbm [thread:$0]  %s1461_s6, 128, %s2356_s5, [#allocation4]  }
 0xbc8   :  { %2083 = dma.done.wait [#allocation4], 128  }
 0xbc9   :  { %2084 = vsyncadd [#allocation4], 4294967168 }
 0xbca   :  { %1467 = vsyncpa [#allocation3], 1 }
 0xbcb   :  { %1468 = vsyncpa [#allocation6], 1 }
 0xbcc   :  { %1469 = vsyncpa [#allocation4], 1 }

</bundles_post_ra>
